<compile_context>
chip_gen: v7x
topology: tpu7x:2x2x1
jax: 0.10.0
libtpu: 0.0.40
codegen_flags: <defaults>
</compile_context>

<pallas_src>
import functools
import math

import jax
import jax.numpy as jnp
from jax.experimental import pallas as pl
from jax.experimental.pallas import tpu as pltpu

TEMPERATURE = 0.01
EPS = 1e-5
SAMPLE_MIN_WEIGHT = 1.0
BATCH_MAX_WEIGHT = 1.0


def _round_up(a, b):
    return ((a + b - 1) // b) * b


def _num_tensorcores():
    """Best-effort TensorCore count (2 on v7x, 1 on v5e/v6e); safe fallback 1."""
    try:
        n = getattr(jax.devices()[0], "num_cores", None)
        if isinstance(n, int) and n > 0:
            return min(n, 2)
    except Exception:
        pass
    return 1


def _pick_tile(per_core_cols, block_tokens, K, gd, budget=32 * 1024 * 1024):
    """Largest 128-aligned lane tile whose scratch + double-buffered I/O fits VMEM."""
    tn = min(_round_up(max(block_tokens, 128), 128),
             _round_up(max(per_core_cols, 1), 128))

    def vmem_bytes(t):
        scratch = 4 * t * (K + 2 * gd)        # probs + entropy + commit (f32)
        inout = 2 * t * gd * (4 + 2)          # double-buffered f32 in + bf16 out
        return scratch + inout

    while tn > 128 and vmem_bytes(tn) > budget:
        tn = _round_up(tn // 2, 128)
    return tn


def _kron_tree(factors):
    """Balanced Kronecker tree over per-bit (2, tn) Bernoulli factors.

    factors[0] carries the least-significant bit; output row j of the
    (2^D, tn) result equals prod_d factor_d[bit_d(j)], with j = sum_d bit_d*2^d
    -- the module's codebook ordering (mask = 2**arange(D))."""
    while len(factors) > 1:
        nxt = []
        for i in range(0, len(factors) - 1, 2):
            lo, hi = factors[i], factors[i + 1]
            nxt.append(jnp.concatenate(
                [hi[j:j + 1, :] * lo for j in range(hi.shape[0])], axis=0))
        if len(factors) % 2:
            nxt.append(factors[-1])
        factors = nxt
    return factors[0]


def _lfq_kernel(x_ref, q_ref, sump_ref, sent_ref, com_ref,
                sump_scr, ent_scr, com_scr, *, groups, feat_dim, inv_temp):
    s = pl.program_id(1)
    steps = pl.num_programs(1)

    @pl.when(s == 0)
    def _init():
        sump_scr[...] = jnp.zeros_like(sump_scr)
        ent_scr[...] = jnp.zeros_like(ent_scr)
        com_scr[...] = jnp.zeros_like(com_scr)

    x = x_ref[...].astype(jnp.float32)               # (G*D, tn), sublane-packed

    # Sign quantization; x + (q - x).detach() == q in the forward pass.
    q = jnp.where(x > 0, 1.0, -1.0)
    q_ref[...] = q.astype(q_ref.dtype)

    # Commitment (MSE) partial sums, lane-wide; reduced once at finalize.
    diff = x - q
    com_scr[...] += diff * diff

    # softmax(2 x . codebook / T) factorizes over bits: P(bit_d=+1)=sigmoid(4 x_d/T)
    a = x * (4.0 * inv_temp)
    absa = jnp.abs(a)
    e = jnp.exp(-absa)                               # <= 1, never overflows
    inv1pe = pl.reciprocal(1.0 + e, approx=True)     # EUP slot, off the VALU
    sig_lo = e * inv1pe                              # sigmoid(-|a|)
    pp = jnp.where(a >= 0, inv1pe, sig_lo)           # P(bit = +1)

    # Per-sample softmax entropy == sum of per-bit binary entropies.
    # H(|a|) = log(1 + e^-|a|) + |a| * sigmoid(-|a|)   (stable: no 0*log 0)
    ent_scr[...] += jnp.log(1.0 + e) + absa * sig_lo

    # Per-token probs over all 2^D codes = Kronecker product of per-bit
    # Bernoullis (balanced tree), one (K, tn) tile per packed token group.
    probs = None
    for g in range(groups):
        base = []
        for d in range(feat_dim):
            row = pp[g * feat_dim + d:g * feat_dim + d + 1, :]    # (1, tn)
            base.append(jnp.concatenate([1.0 - row, row], axis=0))
        p_g = _kron_tree(base)                       # (K, tn)
        probs = p_g if probs is None else probs + p_g
    sump_scr[...] += probs

    @pl.when(s == steps - 1)
    def _finalize():
        sump_ref[...] = jnp.sum(sump_scr[...], axis=1,
                                keepdims=True).reshape(sump_ref.shape)
        sent_ref[...] = jnp.sum(ent_scr[...]).reshape(sent_ref.shape)
        com_ref[...] = jnp.sum(com_scr[...]).reshape(com_ref.shape)


def lfq_forward(x_nchw, codebook_size, num_codebooks=1, block_tokens=32768,
                core_split=None):
    """Training-mode forward of LFQQuantizer (format='bchw').

    block_tokens is the lane-tile width in *packed columns* (each column holds
    G = 8 // log2(K) tokens for f32 inputs)."""
    b, c, h, w = x_nchw.shape
    cb_dim = int(math.log2(codebook_size))
    K = codebook_size
    assert c == num_codebooks * cb_dim, "channels must equal num_codebooks * log2(K)"
    if core_split is None:
        core_split = _num_tensorcores()

    # b (nc d) h w -> d (b h w nc): token axis on lanes (lane-dense layout).
    x_t = x_nchw.reshape(b, num_codebooks, cb_dim, h, w)
    x_t = jnp.transpose(x_t, (2, 0, 3, 4, 1)).reshape(cb_dim, -1)
    M = x_t.shape[1]

    # Pack G token groups onto sublanes so the per-bit math fills f32 vregs.
    G = max(1, 8 // cb_dim)
    Mg = _round_up(M, G)
    if Mg > M:
        x_t = jnp.pad(x_t, ((0, 0), (0, Mg - M)))    # exact zeros (see correction)
    Mp = Mg // G
    gd = G * cb_dim
    x_p = jnp.transpose(x_t.reshape(cb_dim, G, Mp), (1, 0, 2)).reshape(gd, Mp)

    per_core = -(-Mp // core_split)
    tn = _pick_tile(per_core, block_tokens, K, gd)
    steps = -(-per_core // tn)
    mp_pad = core_split * steps * tn
    if mp_pad > Mp:
        x_p = jnp.pad(x_p, ((0, 0), (0, mp_pad - Mp)))
    n_pad = G * mp_pad - M          # zero tokens; corrected analytically below

    kernel = functools.partial(_lfq_kernel, groups=G, feat_dim=cb_dim,
                               inv_temp=1.0 / TEMPERATURE)

    out_shapes = (
        jax.ShapeDtypeStruct((gd, mp_pad), jnp.bfloat16),        # quantized (+/-1 exact)
        jax.ShapeDtypeStruct((core_split, K, 1), jnp.float32),   # per-core sum of probs
        jax.ShapeDtypeStruct((core_split, 1, 1), jnp.float32),   # per-core entropy sum
        jax.ShapeDtypeStruct((core_split, 1, 1), jnp.float32),   # per-core commit sum
    )

    grid_spec = pltpu.PrefetchScalarGridSpec(
        num_scalar_prefetch=0,
        grid=(core_split, steps),
        in_specs=[pl.BlockSpec((gd, tn), lambda ci, si: (0, ci * steps + si))],
        out_specs=(
            pl.BlockSpec((gd, tn), lambda ci, si: (0, ci * steps + si)),
            pl.BlockSpec((1, K, 1), lambda ci, si: (ci, 0, 0)),
            pl.BlockSpec((1, 1, 1), lambda ci, si: (ci, 0, 0)),
            pl.BlockSpec((1, 1, 1), lambda ci, si: (ci, 0, 0)),
        ),
        scratch_shapes=[
            pltpu.VMEM((K, tn), jnp.float32),        # running sum of probs
            pltpu.VMEM((gd, tn), jnp.float32),       # running per-bit entropies
            pltpu.VMEM((gd, tn), jnp.float32),       # running squared commit error
        ],
    )

    q_p, sump_part, sent_part, com_part = pl.pallas_call(
        kernel,
        out_shape=out_shapes,
        grid_spec=grid_spec,
        compiler_params=pltpu.CompilerParams(
            dimension_semantics=("parallel", "arbitrary"),
            vmem_limit_bytes=48 * 1024 * 1024),
    )(x_p)

    # Unpack: (G*D, Mp_pad) -> (D, M) -> b (nc d) h w.
    q_t = jnp.transpose(q_p[:, :Mp].reshape(G, cb_dim, Mp),
                        (1, 0, 2)).reshape(cb_dim, Mg)[:, :M]
    q_t = q_t.astype(x_nchw.dtype).reshape(cb_dim, b, h, w, num_codebooks)
    quantized = jnp.transpose(q_t, (1, 4, 0, 2, 3)).reshape(b, c, h, w)

    # Analytic removal of the zero-padding contributions (pads are exact zeros:
    # each pad token adds 1/K per code to sum_probs, D*ln2 to the entropy sum
    # and D to the commit sum).
    sum_probs = jnp.sum(sump_part[:, :, 0], axis=0) - n_pad / K
    sent_sum = jnp.sum(sent_part) - n_pad * cb_dim * math.log(2.0)
    com_sum = jnp.sum(com_part) - n_pad * cb_dim

    # Tiny O(K) finalization of the scalar losses (training-mode semantics).
    avg_probs = sum_probs / M
    codebook_entropy = -jnp.sum(avg_probs * jnp.log(avg_probs + EPS))
    per_sample_entropy = sent_sum / M
    commit_loss = com_sum / (M * cb_dim)
    aux = (SAMPLE_MIN_WEIGHT * per_sample_entropy
           - BATCH_MAX_WEIGHT * codebook_entropy)

    info = {
        "entropy_aux_loss": aux,
        "per_sample_entropy": per_sample_entropy,
        "codebook_entropy": codebook_entropy,
        "commit_loss": commit_loss,
    }
    return quantized, info


# ----------------------------- reference & test -----------------------------

def make_codebook(codebook_size):
    """codebook[j] = bits(j) * 2 - 1, bit order = 2**arange(log2(K)) as in the module."""
    d = int(math.log2(codebook_size))
    codes = jnp.arange(codebook_size, dtype=jnp.int32)
    mask = (2 ** jnp.arange(d)).astype(jnp.int32)
    bits = (codes[:, None] & mask[None, :]) != 0
    return bits.astype(jnp.float32) * 2.0 - 1.0                 # (K, D)


def _reference(x_nchw, codebook, num_codebooks=1):
    b, c, h, w = x_nchw.shape
    K, dd = codebook.shape
    xr = jnp.transpose(x_nchw, (0, 2, 3, 1)).reshape(b, h * w, num_codebooks, dd)
    xr = xr.reshape(-1, dd)
    q = jnp.where(xr > 0, 1.0, -1.0)
    logits = 2.0 * xr @ codebook.T
    probs = jax.nn.softmax(logits / TEMPERATURE, axis=-1)
    log_probs = jax.nn.log_softmax(logits / TEMPERATURE + EPS, axis=-1)
    avg_probs = probs.mean(axis=0)
    avg_entropy = -jnp.sum(avg_probs * jnp.log(avg_probs + EPS))
    sample_entropy = jnp.mean(-jnp.sum(probs * log_probs, axis=-1))
    aux = SAMPLE_MIN_WEIGHT * sample_entropy - BATCH_MAX_WEIGHT * avg_entropy
    commit = jnp.mean((xr - q) ** 2)
    q_bchw = q.reshape(b, h * w, c).transpose(0, 2, 1).reshape(b, c, h, w)
    return q_bchw, sample_entropy, avg_entropy, aux, commit


def _check(x, quantized, info, codebook_size, num_codebooks=1):
    codebook = make_codebook(codebook_size)
    q_ref, pse_r, cbe_r, aux_r, cl_r = _reference(x, codebook, num_codebooks)
    assert jnp.array_equal(quantized, q_ref.astype(quantized.dtype))
    assert jnp.allclose(info["per_sample_entropy"], pse_r, rtol=2e-3, atol=2e-4)
    assert jnp.allclose(info["codebook_entropy"], cbe_r, rtol=2e-3, atol=2e-4)
    assert jnp.allclose(info["entropy_aux_loss"], aux_r, rtol=2e-3, atol=5e-4)
    assert jnp.allclose(info["commit_loss"], cl_r, rtol=2e-3, atol=2e-5)


if __name__ == "__main__":
    key = jax.random.PRNGKey(0)
    k1, k2, k3, k4 = jax.random.split(key, 4)

    codebook_size, num_codebooks = 16, 1
    dd = int(math.log2(codebook_size))
    channels = num_codebooks * dd

    # Case 1: evenly tiled input, single-step path (init+finalize same step).
    x1 = jax.random.normal(k1, (2, channels, 16, 16), dtype=jnp.float32)
    q1, info1 = lfq_forward(x1, codebook_size, num_codebooks=num_codebooks)
    jax.block_until_ready((q1, info1))
    _check(x1, q1, info1, codebook_size, num_codebooks)

    # Case 2: ragged token count + small tile -> multi-step accumulation and
    # analytic zero-padding correction.
    x2 = jax.random.normal(k2, (2, channels, 10, 13), dtype=jnp.float32)
    q2, info2 = lfq_forward(x2, codebook_size, num_codebooks=num_codebooks,
                            block_tokens=128)
    jax.block_until_ready((q2, info2))
    _check(x2, q2, info2, codebook_size, num_codebooks)

    # Case 3: explicit core_split=2 ("parallel" core axis), heavy padding on
    # the second core slice (all analytically corrected).
    x3 = jax.random.normal(k3, (1, channels, 12, 12), dtype=jnp.float32)
    q3, info3 = lfq_forward(x3, codebook_size, num_codebooks=num_codebooks,
                            block_tokens=128, core_split=2)
    jax.block_until_ready((q3, info3))
    _check(x3, q3, info3, codebook_size, num_codebooks)

    # Case 4: multiple codebooks.
    x4 = jax.random.normal(k4, (1, 2 * dd, 8, 8), dtype=jnp.float32)
    q4, info4 = lfq_forward(x4, codebook_size, num_codebooks=2)
    jax.block_until_ready((q4, info4))
    _check(x4, q4, info4, codebook_size, num_codebooks=2)

    # TODO(synk): eval-mode (self.training == False) branch that returns zero
    # losses is not implemented; kernel matches the training-mode forward.
    print("KERNEL_OK")
</pallas_src>

<mosaic_0001>
module attributes {stable_mosaic.version = 11 : i64} {
  func.func @_lfq_kernel(%arg0: i32, %arg1: i32, %arg2: memref<8x256xf32, #tpu.memory_space<vmem>>, %arg3: memref<8x256xbf16, #tpu.memory_space<vmem>>, %arg4: memref<1x16x1xf32, #tpu.memory_space<vmem>>, %arg5: memref<1x1x1xf32, #tpu.memory_space<vmem>>, %arg6: memref<1x1x1xf32, #tpu.memory_space<vmem>>, %arg7: memref<16x256xf32, #tpu.memory_space<vmem>>, %arg8: memref<8x256xf32, #tpu.memory_space<vmem>>, %arg9: memref<8x256xf32, #tpu.memory_space<vmem>>) attributes {dimension_semantics = [#tpu.dimension_semantics<parallel>, #tpu.dimension_semantics<arbitrary>], iteration_bounds = array<i64: 1, 1>, scalar_prefetch = 0 : i64, scratch_operands = 3 : i64, tpu.core_type = #tpu.core_type<tc>, window_params = [{transform_indices = @transform_0, window_bounds = array<i64: 8, 256>}, {transform_indices = @transform_1, window_bounds = array<i64: 8, 256>}, {transform_indices = @transform_2, window_bounds = array<i64: 1, 16, 1>}, {transform_indices = @transform_3, window_bounds = array<i64: 1, 1, 1>}, {transform_indices = @transform_4, window_bounds = array<i64: 1, 1, 1>}]} {
    %c0_i32 = arith.constant 0 : i32
    %0 = arith.cmpi eq, %arg1, %c0_i32 : i32
    %1 = arith.extui %0 : i1 to i32
    %c0_i32_0 = arith.constant 0 : i32
    %2 = arith.cmpi ne, %1, %c0_i32_0 : i32
    scf.if %2 {
      %cst_33 = arith.constant 0.000000e+00 : f32
      %130 = vector.broadcast %cst_33 : f32 to vector<16x256xf32>
      %c0_34 = arith.constant 0 : index
      %c0_35 = arith.constant 0 : index
      %131 = vector.load %arg7[%c0_34, %c0_35] : memref<16x256xf32, #tpu.memory_space<vmem>>, vector<16x256xf32>
      tpu.vector_store %arg7[%c0_34, %c0_35], %130 {strides = array<i32>} : memref<16x256xf32, #tpu.memory_space<vmem>>, vector<16x256xf32>,
      %cst_36 = arith.constant 0.000000e+00 : f32
      %132 = vector.broadcast %cst_36 : f32 to vector<8x256xf32>
      %c0_37 = arith.constant 0 : index
      %c0_38 = arith.constant 0 : index
      %133 = vector.load %arg8[%c0_37, %c0_38] : memref<8x256xf32, #tpu.memory_space<vmem>>, vector<8x256xf32>
      tpu.vector_store %arg8[%c0_37, %c0_38], %132 {strides = array<i32>} : memref<8x256xf32, #tpu.memory_space<vmem>>, vector<8x256xf32>,
      %cst_39 = arith.constant 0.000000e+00 : f32
      %134 = vector.broadcast %cst_39 : f32 to vector<8x256xf32>
      %c0_40 = arith.constant 0 : index
      %c0_41 = arith.constant 0 : index
      %135 = vector.load %arg9[%c0_40, %c0_41] : memref<8x256xf32, #tpu.memory_space<vmem>>, vector<8x256xf32>
      tpu.vector_store %arg9[%c0_40, %c0_41], %134 {strides = array<i32>} : memref<8x256xf32, #tpu.memory_space<vmem>>, vector<8x256xf32>,
    } else {
    }
    %c0 = arith.constant 0 : index
    %c0_1 = arith.constant 0 : index
    %3 = vector.load %arg2[%c0, %c0_1] : memref<8x256xf32, #tpu.memory_space<vmem>>, vector<8x256xf32>
    %cst = arith.constant 0.000000e+00 : f32
    %4 = vector.broadcast %cst : f32 to vector<8x256xf32>
    %5 = arith.cmpf ogt, %3, %4 : vector<8x256xf32>
    %cst_2 = arith.constant 1.000000e+00 : f32
    %cst_3 = arith.constant -1.000000e+00 : f32
    %6 = vector.broadcast %cst_2 : f32 to vector<8x256xf32>
    %7 = vector.broadcast %cst_3 : f32 to vector<8x256xf32>
    %8 = arith.select %5, %6, %7 : vector<8x256xi1>, vector<8x256xf32>
    %9 = arith.truncf %8 : vector<8x256xf32> to vector<8x256xbf16>
    %c0_4 = arith.constant 0 : index
    %c0_5 = arith.constant 0 : index
    %10 = vector.load %arg3[%c0_4, %c0_5] : memref<8x256xbf16, #tpu.memory_space<vmem>>, vector<8x256xbf16>
    tpu.vector_store %arg3[%c0_4, %c0_5], %9 {strides = array<i32>} : memref<8x256xbf16, #tpu.memory_space<vmem>>, vector<8x256xbf16>,
    %11 = arith.subf %3, %8 : vector<8x256xf32>
    %c0_6 = arith.constant 0 : index
    %c0_7 = arith.constant 0 : index
    %12 = vector.load %arg9[%c0_6, %c0_7] : memref<8x256xf32, #tpu.memory_space<vmem>>, vector<8x256xf32>
    %13 = arith.mulf %11, %11 : vector<8x256xf32>
    %14 = arith.addf %12, %13 : vector<8x256xf32>
    %c0_8 = arith.constant 0 : index
    %c0_9 = arith.constant 0 : index
    %15 = vector.load %arg9[%c0_8, %c0_9] : memref<8x256xf32, #tpu.memory_space<vmem>>, vector<8x256xf32>
    tpu.vector_store %arg9[%c0_8, %c0_9], %14 {strides = array<i32>} : memref<8x256xf32, #tpu.memory_space<vmem>>, vector<8x256xf32>,
    %cst_10 = arith.constant 4.000000e+02 : f32
    %16 = vector.broadcast %cst_10 : f32 to vector<8x256xf32>
    %17 = arith.mulf %3, %16 : vector<8x256xf32>
    %18 = math.absf %17 : vector<8x256xf32>
    %cst_11 = arith.constant 0.000000e+00 : f32
    %19 = vector.broadcast %cst_11 : f32 to vector<8x256xf32>
    %20 = arith.subf %19, %18 : vector<8x256xf32>
    %21 = math.exp %20 : vector<8x256xf32>
    %cst_12 = arith.constant 1.000000e+00 : f32
    %22 = vector.broadcast %cst_12 : f32 to vector<8x256xf32>
    %23 = arith.addf %22, %21 : vector<8x256xf32>
    %24 = tpu.reciprocal %23 {approx = true} : vector<8x256xf32> -> vector<8x256xf32>
    %25 = arith.mulf %21, %24 : vector<8x256xf32>
    %cst_13 = arith.constant 0.000000e+00 : f32
    %26 = vector.broadcast %cst_13 : f32 to vector<8x256xf32>
    %27 = arith.cmpf oge, %17, %26 : vector<8x256xf32>
    %28 = arith.select %27, %24, %25 : vector<8x256xi1>, vector<8x256xf32>
    %c0_14 = arith.constant 0 : index
    %c0_15 = arith.constant 0 : index
    %29 = vector.load %arg8[%c0_14, %c0_15] : memref<8x256xf32, #tpu.memory_space<vmem>>, vector<8x256xf32>
    %cst_16 = arith.constant 1.000000e+00 : f32
    %30 = vector.broadcast %cst_16 : f32 to vector<8x256xf32>
    %31 = arith.addf %30, %21 : vector<8x256xf32>
    %32 = math.log %31 : vector<8x256xf32>
    %33 = arith.mulf %18, %25 : vector<8x256xf32>
    %34 = arith.addf %32, %33 : vector<8x256xf32>
    %35 = arith.addf %29, %34 : vector<8x256xf32>
    %c0_17 = arith.constant 0 : index
    %c0_18 = arith.constant 0 : index
    %36 = vector.load %arg8[%c0_17, %c0_18] : memref<8x256xf32, #tpu.memory_space<vmem>>, vector<8x256xf32>
    tpu.vector_store %arg8[%c0_17, %c0_18], %35 {strides = array<i32>} : memref<8x256xf32, #tpu.memory_space<vmem>>, vector<8x256xf32>,
    %37 = vector.extract_strided_slice %28 {offsets = [0, 0], sizes = [1, 256], strides = [1, 1]} : vector<8x256xf32> to vector<1x256xf32>
    %cst_19 = arith.constant 1.000000e+00 : f32
    %38 = vector.broadcast %cst_19 : f32 to vector<1x256xf32>
    %39 = arith.subf %38, %37 : vector<1x256xf32>
    %40 = tpu.concatenate %39, %37 in 0 : vector<1x256xf32>, vector<1x256xf32> -> vector<2x256xf32>
    %41 = vector.extract_strided_slice %28 {offsets = [1, 0], sizes = [1, 256], strides = [1, 1]} : vector<8x256xf32> to vector<1x256xf32>
    %cst_20 = arith.constant 1.000000e+00 : f32
    %42 = vector.broadcast %cst_20 : f32 to vector<1x256xf32>
    %43 = arith.subf %42, %41 : vector<1x256xf32>
    %44 = tpu.concatenate %43, %41 in 0 : vector<1x256xf32>, vector<1x256xf32> -> vector<2x256xf32>
    %45 = vector.extract_strided_slice %28 {offsets = [2, 0], sizes = [1, 256], strides = [1, 1]} : vector<8x256xf32> to vector<1x256xf32>
    %cst_21 = arith.constant 1.000000e+00 : f32
    %46 = vector.broadcast %cst_21 : f32 to vector<1x256xf32>
    %47 = arith.subf %46, %45 : vector<1x256xf32>
    %48 = tpu.concatenate %47, %45 in 0 : vector<1x256xf32>, vector<1x256xf32> -> vector<2x256xf32>
    %49 = vector.extract_strided_slice %28 {offsets = [3, 0], sizes = [1, 256], strides = [1, 1]} : vector<8x256xf32> to vector<1x256xf32>
    %cst_22 = arith.constant 1.000000e+00 : f32
    %50 = vector.broadcast %cst_22 : f32 to vector<1x256xf32>
    %51 = arith.subf %50, %49 : vector<1x256xf32>
    %52 = tpu.concatenate %51, %49 in 0 : vector<1x256xf32>, vector<1x256xf32> -> vector<2x256xf32>
    %53 = vector.extract_strided_slice %44 {offsets = [0, 0], sizes = [1, 256], strides = [1, 1]} : vector<2x256xf32> to vector<1x256xf32>
    %54 = vector.broadcast %53 : vector<1x256xf32> to vector<2x256xf32>
    %55 = arith.mulf %54, %40 : vector<2x256xf32>
    %56 = vector.extract_strided_slice %44 {offsets = [1, 0], sizes = [1, 256], strides = [1, 1]} : vector<2x256xf32> to vector<1x256xf32>
    %57 = vector.broadcast %56 : vector<1x256xf32> to vector<2x256xf32>
    %58 = arith.mulf %57, %40 : vector<2x256xf32>
    %59 = tpu.concatenate %55, %58 in 0 : vector<2x256xf32>, vector<2x256xf32> -> vector<4x256xf32>
    %60 = vector.extract_strided_slice %52 {offsets = [0, 0], sizes = [1, 256], strides = [1, 1]} : vector<2x256xf32> to vector<1x256xf32>
    %61 = vector.broadcast %60 : vector<1x256xf32> to vector<2x256xf32>
    %62 = arith.mulf %61, %48 : vector<2x256xf32>
    %63 = vector.extract_strided_slice %52 {offsets = [1, 0], sizes = [1, 256], strides = [1, 1]} : vector<2x256xf32> to vector<1x256xf32>
    %64 = vector.broadcast %63 : vector<1x256xf32> to vector<2x256xf32>
    %65 = arith.mulf %64, %48 : vector<2x256xf32>
    %66 = tpu.concatenate %62, %65 in 0 : vector<2x256xf32>, vector<2x256xf32> -> vector<4x256xf32>
    %67 = vector.extract_strided_slice %66 {offsets = [0, 0], sizes = [1, 256], strides = [1, 1]} : vector<4x256xf32> to vector<1x256xf32>
    %68 = vector.broadcast %67 : vector<1x256xf32> to vector<4x256xf32>
    %69 = arith.mulf %68, %59 : vector<4x256xf32>
    %70 = vector.extract_strided_slice %66 {offsets = [1, 0], sizes = [1, 256], strides = [1, 1]} : vector<4x256xf32> to vector<1x256xf32>
    %71 = vector.broadcast %70 : vector<1x256xf32> to vector<4x256xf32>
    %72 = arith.mulf %71, %59 : vector<4x256xf32>
    %73 = vector.extract_strided_slice %66 {offsets = [2, 0], sizes = [1, 256], strides = [1, 1]} : vector<4x256xf32> to vector<1x256xf32>
    %74 = vector.broadcast %73 : vector<1x256xf32> to vector<4x256xf32>
    %75 = arith.mulf %74, %59 : vector<4x256xf32>
    %76 = vector.extract_strided_slice %66 {offsets = [3, 0], sizes = [1, 256], strides = [1, 1]} : vector<4x256xf32> to vector<1x256xf32>
    %77 = vector.broadcast %76 : vector<1x256xf32> to vector<4x256xf32>
    %78 = arith.mulf %77, %59 : vector<4x256xf32>
    %79 = tpu.concatenate %69, %72, %75, %78 in 0 : vector<4x256xf32>, vector<4x256xf32>, vector<4x256xf32>, vector<4x256xf32> -> vector<16x256xf32>
    %80 = vector.extract_strided_slice %28 {offsets = [4, 0], sizes = [1, 256], strides = [1, 1]} : vector<8x256xf32> to vector<1x256xf32>
    %cst_23 = arith.constant 1.000000e+00 : f32
    %81 = vector.broadcast %cst_23 : f32 to vector<1x256xf32>
    %82 = arith.subf %81, %80 : vector<1x256xf32>
    %83 = tpu.concatenate %82, %80 in 0 : vector<1x256xf32>, vector<1x256xf32> -> vector<2x256xf32>
    %84 = vector.extract_strided_slice %28 {offsets = [5, 0], sizes = [1, 256], strides = [1, 1]} : vector<8x256xf32> to vector<1x256xf32>
    %cst_24 = arith.constant 1.000000e+00 : f32
    %85 = vector.broadcast %cst_24 : f32 to vector<1x256xf32>
    %86 = arith.subf %85, %84 : vector<1x256xf32>
    %87 = tpu.concatenate %86, %84 in 0 : vector<1x256xf32>, vector<1x256xf32> -> vector<2x256xf32>
    %88 = vector.extract_strided_slice %28 {offsets = [6, 0], sizes = [1, 256], strides = [1, 1]} : vector<8x256xf32> to vector<1x256xf32>
    %cst_25 = arith.constant 1.000000e+00 : f32
    %89 = vector.broadcast %cst_25 : f32 to vector<1x256xf32>
    %90 = arith.subf %89, %88 : vector<1x256xf32>
    %91 = tpu.concatenate %90, %88 in 0 : vector<1x256xf32>, vector<1x256xf32> -> vector<2x256xf32>
    %92 = vector.extract_strided_slice %28 {offsets = [7, 0], sizes = [1, 256], strides = [1, 1]} : vector<8x256xf32> to vector<1x256xf32>
    %cst_26 = arith.constant 1.000000e+00 : f32
    %93 = vector.broadcast %cst_26 : f32 to vector<1x256xf32>
    %94 = arith.subf %93, %92 : vector<1x256xf32>
    %95 = tpu.concatenate %94, %92 in 0 : vector<1x256xf32>, vector<1x256xf32> -> vector<2x256xf32>
    %96 = vector.extract_strided_slice %87 {offsets = [0, 0], sizes = [1, 256], strides = [1, 1]} : vector<2x256xf32> to vector<1x256xf32>
    %97 = vector.broadcast %96 : vector<1x256xf32> to vector<2x256xf32>
    %98 = arith.mulf %97, %83 : vector<2x256xf32>
    %99 = vector.extract_strided_slice %87 {offsets = [1, 0], sizes = [1, 256], strides = [1, 1]} : vector<2x256xf32> to vector<1x256xf32>
    %100 = vector.broadcast %99 : vector<1x256xf32> to vector<2x256xf32>
    %101 = arith.mulf %100, %83 : vector<2x256xf32>
    %102 = tpu.concatenate %98, %101 in 0 : vector<2x256xf32>, vector<2x256xf32> -> vector<4x256xf32>
    %103 = vector.extract_strided_slice %95 {offsets = [0, 0], sizes = [1, 256], strides = [1, 1]} : vector<2x256xf32> to vector<1x256xf32>
    %104 = vector.broadcast %103 : vector<1x256xf32> to vector<2x256xf32>
    %105 = arith.mulf %104, %91 : vector<2x256xf32>
    %106 = vector.extract_strided_slice %95 {offsets = [1, 0], sizes = [1, 256], strides = [1, 1]} : vector<2x256xf32> to vector<1x256xf32>
    %107 = vector.broadcast %106 : vector<1x256xf32> to vector<2x256xf32>
    %108 = arith.mulf %107, %91 : vector<2x256xf32>
    %109 = tpu.concatenate %105, %108 in 0 : vector<2x256xf32>, vector<2x256xf32> -> vector<4x256xf32>
    %110 = vector.extract_strided_slice %109 {offsets = [0, 0], sizes = [1, 256], strides = [1, 1]} : vector<4x256xf32> to vector<1x256xf32>
    %111 = vector.broadcast %110 : vector<1x256xf32> to vector<4x256xf32>
    %112 = arith.mulf %111, %102 : vector<4x256xf32>
    %113 = vector.extract_strided_slice %109 {offsets = [1, 0], sizes = [1, 256], strides = [1, 1]} : vector<4x256xf32> to vector<1x256xf32>
    %114 = vector.broadcast %113 : vector<1x256xf32> to vector<4x256xf32>
    %115 = arith.mulf %114, %102 : vector<4x256xf32>
    %116 = vector.extract_strided_slice %109 {offsets = [2, 0], sizes = [1, 256], strides = [1, 1]} : vector<4x256xf32> to vector<1x256xf32>
    %117 = vector.broadcast %116 : vector<1x256xf32> to vector<4x256xf32>
    %118 = arith.mulf %117, %102 : vector<4x256xf32>
    %119 = vector.extract_strided_slice %109 {offsets = [3, 0], sizes = [1, 256], strides = [1, 1]} : vector<4x256xf32> to vector<1x256xf32>
    %120 = vector.broadcast %119 : vector<1x256xf32> to vector<4x256xf32>
    %121 = arith.mulf %120, %102 : vector<4x256xf32>
    %122 = tpu.concatenate %112, %115, %118, %121 in 0 : vector<4x256xf32>, vector<4x256xf32>, vector<4x256xf32>, vector<4x256xf32> -> vector<16x256xf32>
    %123 = arith.addf %79, %122 : vector<16x256xf32>
    %c0_27 = arith.constant 0 : index
    %c0_28 = arith.constant 0 : index
    %124 = vector.load %arg7[%c0_27, %c0_28] : memref<16x256xf32, #tpu.memory_space<vmem>>, vector<16x256xf32>
    %125 = arith.addf %124, %123 : vector<16x256xf32>
    %c0_29 = arith.constant 0 : index
    %c0_30 = arith.constant 0 : index
    %126 = vector.load %arg7[%c0_29, %c0_30] : memref<16x256xf32, #tpu.memory_space<vmem>>, vector<16x256xf32>
    tpu.vector_store %arg7[%c0_29, %c0_30], %125 {strides = array<i32>} : memref<16x256xf32, #tpu.memory_space<vmem>>, vector<16x256xf32>,
    %c0_i32_31 = arith.constant 0 : i32
    %127 = arith.cmpi eq, %arg1, %c0_i32_31 : i32
    %128 = arith.extui %127 : i1 to i32
    %c0_i32_32 = arith.constant 0 : i32
    %129 = arith.cmpi ne, %128, %c0_i32_32 : i32
    scf.if %129 {
      %c0_33 = arith.constant 0 : index
      %c0_34 = arith.constant 0 : index
      %130 = vector.load %arg7[%c0_33, %c0_34] : memref<16x256xf32, #tpu.memory_space<vmem>>, vector<16x256xf32>
      %cst_35 = arith.constant dense<0.000000e+00> : vector<16xf32>
      %131 = vector.multi_reduction <add>, %130, %cst_35 [1] : vector<16x256xf32> to vector<16xf32>
      %132 = vector.shape_cast %131 : vector<16xf32> to vector<16x1xf32>
      %133 = vector.shape_cast %132 : vector<16x1xf32> to vector<1x16x1xf32>
      %c0_36 = arith.constant 0 : index
      %c0_37 = arith.constant 0 : index
      %c0_38 = arith.constant 0 : index
      %134 = vector.load %arg4[%c0_36, %c0_37, %c0_38] : memref<1x16x1xf32, #tpu.memory_space<vmem>>, vector<1x16x1xf32>
      tpu.vector_store %arg4[%c0_36, %c0_37, %c0_38], %133 {strides = array<i32>} : memref<1x16x1xf32, #tpu.memory_space<vmem>>, vector<1x16x1xf32>,
      %c0_39 = arith.constant 0 : index
      %c0_40 = arith.constant 0 : index
      %135 = vector.load %arg8[%c0_39, %c0_40] : memref<8x256xf32, #tpu.memory_space<vmem>>, vector<8x256xf32>
      %136 = vector.shape_cast %135 : vector<8x256xf32> to vector<1x8x256xf32>
      %cst_41 = arith.constant dense<0.000000e+00> : vector<1xf32>
      %137 = vector.multi_reduction <add>, %136, %cst_41 [1, 2] : vector<1x8x256xf32> to vector<1xf32>
      %138 = vector.shape_cast %137 : vector<1xf32> to vector<1x1x1xf32>
      %139 = vector.extract %138[0, 0, 0] : f32 from vector<1x1x1xf32>
      %140 = vector.broadcast %139 : f32 to vector<1x1x1xf32>
      %c0_42 = arith.constant 0 : index
      %c0_43 = arith.constant 0 : index
      %c0_44 = arith.constant 0 : index
      %141 = vector.load %arg5[%c0_42, %c0_43, %c0_44] : memref<1x1x1xf32, #tpu.memory_space<vmem>>, vector<1x1x1xf32>
      tpu.vector_store %arg5[%c0_42, %c0_43, %c0_44], %140 {strides = array<i32>} : memref<1x1x1xf32, #tpu.memory_space<vmem>>, vector<1x1x1xf32>,
      %c0_45 = arith.constant 0 : index
      %c0_46 = arith.constant 0 : index
      %142 = vector.load %arg9[%c0_45, %c0_46] : memref<8x256xf32, #tpu.memory_space<vmem>>, vector<8x256xf32>
      %143 = vector.shape_cast %142 : vector<8x256xf32> to vector<1x8x256xf32>
      %cst_47 = arith.constant dense<0.000000e+00> : vector<1xf32>
      %144 = vector.multi_reduction <add>, %143, %cst_47 [1, 2] : vector<1x8x256xf32> to vector<1xf32>
      %145 = vector.shape_cast %144 : vector<1xf32> to vector<1x1x1xf32>
      %146 = vector.extract %145[0, 0, 0] : f32 from vector<1x1x1xf32>
      %147 = vector.broadcast %146 : f32 to vector<1x1x1xf32>
      %c0_48 = arith.constant 0 : index
      %c0_49 = arith.constant 0 : index
      %c0_50 = arith.constant 0 : index
      %148 = vector.load %arg6[%c0_48, %c0_49, %c0_50] : memref<1x1x1xf32, #tpu.memory_space<vmem>>, vector<1x1x1xf32>
      tpu.vector_store %arg6[%c0_48, %c0_49, %c0_50], %147 {strides = array<i32>} : memref<1x1x1xf32, #tpu.memory_space<vmem>>, vector<1x1x1xf32>,
    } else {
    }
    return
  }
  func.func @transform_0(%arg0: i32, %arg1: i32) -> (i32, i32) {
    %c1_i32 = arith.constant 1 : i32
    %0 = arith.muli %arg0, %c1_i32 : i32
    %1 = arith.addi %0, %arg1 : i32
    %c0_i32 = arith.constant 0 : i32
    %c0_i32_0 = arith.constant 0 : i32
    return %c0_i32, %1 : i32, i32
  }
  func.func @transform_1(%arg0: i32, %arg1: i32) -> (i32, i32) {
    %c1_i32 = arith.constant 1 : i32
    %0 = arith.muli %arg0, %c1_i32 : i32
    %1 = arith.addi %0, %arg1 : i32
    %c0_i32 = arith.constant 0 : i32
    %c0_i32_0 = arith.constant 0 : i32
    return %c0_i32, %1 : i32, i32
  }
  func.func @transform_2(%arg0: i32, %arg1: i32) -> (i32, i32, i32) {
    %c0_i32 = arith.constant 0 : i32
    %c0_i32_0 = arith.constant 0 : i32
    %c0_i32_1 = arith.constant 0 : i32
    return %arg0, %c0_i32, %c0_i32_0 : i32, i32, i32
  }
  func.func @transform_3(%arg0: i32, %arg1: i32) -> (i32, i32, i32) {
    %c0_i32 = arith.constant 0 : i32
    %c0_i32_0 = arith.constant 0 : i32
    %c0_i32_1 = arith.constant 0 : i32
    return %arg0, %c0_i32, %c0_i32_0 : i32, i32, i32
  }
  func.func @transform_4(%arg0: i32, %arg1: i32) -> (i32, i32, i32) {
    %c0_i32 = arith.constant 0 : i32
    %c0_i32_0 = arith.constant 0 : i32
    %c0_i32_1 = arith.constant 0 : i32
    return %arg0, %c0_i32, %c0_i32_0 : i32, i32, i32
  }
}

</mosaic_0001>

<bundles_post_ra>
// kernel: tpu_custom_call.1
= control target key start
LH: loop header
LB: loop body
LE: loop exit
PB: predicated region body
PF: predicated region fallthrough
CT: control target
= control target key end

     0   :  { %10 = vsyncpa [#allocation6], 0  ;;  %s876_s0 = inlined_call_operand.hbm [shape: f32[8,256], index: 0, kind: input, shape index: {}]   ;;  %s877_s1 = inlined_call_operand.hbm [shape: bf16[8,256], index: 1, kind: output, shape index: {0}]   ;;  %s878_s2 = inlined_call_operand.vmem [shape: f32[1,16,1], index: 2, kind: output, shape index: {1}]   ;;  %s879_s3 = inlined_call_operand.hbm [shape: f32[1,1,1], index: 3, kind: output, shape index: {2}]   ;;  %s880_s4 = inlined_call_operand.hbm [shape: f32[1,1,1], index: 4, kind: output, shape index: {3}]  }
   0x1   :  { %11 = vsyncpa [#allocation7], 0 }
   0x2   :  { %12 = vsyncpa [#allocation10], 0  ;;  %s638_s15 = smov [#allocation5]   ;;  %s544_s19 = scalar_lea.hbm %s876_s0, 256 }
   0x3   :  { %s23_s16 = sshll.u32 %s638_s15, 4  ;;  %p545_p0 = scmp.ne.s32.totalorder %s876_s0, %s544_s19  ;;  %s24_s16 = int_to_ptr.vmem [resolvable:$true] %s23_s16 }
   0x4   :  { %p548_p1 = scmp.lt.u32.totalorder %s544_s19, %s876_s0 }
   0x6   :  { %p550_p2 = pnand %p548_p1, %p545_p0 }
   0x8   :  { %553 = shalt.err (!%p550_p2)
}
   0x9   :  { %s554_s24 = scalar_lea.vmem %s24_s16, 256  ;;  %p559_p4 = scmp.lt.s32.totalorder %s24_s16, %s24_s16 }
   0xa   :  { %p555_p3 = scmp.ne.s32.totalorder %s24_s16, %s554_s24  ;;  %p560_p5 = scmp.lt.s32.totalorder %s554_s24, %s554_s24 }
   0xc   :  { %p561_p6 = por %p560_p5, %p559_p4 }
   0xe   :  { %p562_p7 = pnand %p561_p6, %p555_p3 }
  0x10   :  { %565 = shalt.err (!%p562_p7)
}
  0x11   :  { %26 = dma.hbm_to_vmem [thread:$0]  %s876_s0, 256, %s24_s16, [#allocation6]  }
  0x12   :  { %632 = dma.done.wait [#allocation6], 256  }
  0x13   :  { %633 = vsyncadd [#allocation6], 4294967040  ;;  %v46_v0 = vld [vmem:[#allocation5] sm:$0xff]  ;;  %v47_v1 = vld [vmem:[#allocation5 + $0x8] sm:$0xff]  ;;  %v639_v14 = vmov -1.0   ;;  %v144_v17 = vlaneseq  ;;  %vm113_vm4 = vcmask 1040384  }
  0x14   :  { %v71_v2 = vmul.f32 400.0, %v46_v0  ;;  %v72_v3 = vmul.f32 400.0, %v47_v1  ;;  %vm48_vm0 = vcmp.gt.f32.partialorder %v46_v0, 0.0  ;;  %vm49_vm1 = vcmp.gt.f32.partialorder %v47_v1, 0.0  ;;  %s640_s0 = smov [#allocation8]  }
  0x15   :  { %v680_v15 = vsel %vm48_vm0, 1.0, %v639_v14  ;;  %v682_v16 = vsel %vm49_vm1, 1.0, %v639_v14  ;;  %v686_v23 = vshrl.u32 %v144_v17, 7  ;;  %vm170_vm5 = vcmask 1041408   ;;  %s481_s27 = sshll.u32 %s640_s0, 4  ;;  %s482_s27 = int_to_ptr.vmem [resolvable:$true] %s481_s27 }
  0x16   :  { %v73_v4 = vand.u32 2147483647, %v71_v2  ;;  %v74_v5 = vand.u32 2147483647, %v72_v3  ;;  %v61_v18 = vsub.f32 %v46_v0, %v680_v15  ;;  %v62_v19 = vsub.f32 %v47_v1, %v682_v16  ;;  %s566_s28 = scalar_lea.vmem %s482_s27, 128  ;;  %p571_p9 = scmp.lt.s32.totalorder %s482_s27, %s482_s27 }
  0x17   :  { %vm87_vm2 = vcmp.ge.f32.partialorder %v71_v2, 0.0  ;;  %vm88_vm3 = vcmp.ge.f32.partialorder %v72_v3, 0.0  ;;  %v699_v38 = vsub.s32 0, %v686_v23  ;;  %v702_v39 = vsub.s32 1, %v686_v23  ;;  %p567_p8 = scmp.ne.s32.totalorder %s482_s27, %s566_s28  ;;  %p572_p10 = scmp.lt.s32.totalorder %s566_s28, %s566_s28 }
  0x18   :  { %v75_v6 = vsub.f32 0.0, %v73_v4  ;;  %v76_v7 = vsub.f32 0.0, %v74_v5  ;;  %v65_v26 = vmul.f32 %v61_v18, %v61_v18  ;;  %v66_v31 = vmul.f32 %v62_v19, %v62_v19 }
  0x19   :  { %vm253_vm6 = vcmask 1043456   ;;  %p573_p11 = por %p572_p10, %p571_p9 }
  0x1a   :  { %v77_v8 = vmul.f32 1.442695, %v75_v6  ;;  %v79_v9 = vmul.f32 1.442695, %v76_v7  ;;  %v459_v44 = vadd.f32 %v66_v31, %v65_v26 }
  0x1b   :  { %p574_p12 = pnand %p573_p11, %p567_p8 }
  0x1c   :  { %532 = vpow2.f32 %v77_v8 }
  0x1d   :  { %534 = vpow2.f32 %v79_v9 }
  0x26   :  { %v533_v10 = vpop.eup %532 }
  0x27   :  { %v535_v11 = vpop.eup %534  ;;  %v81_v12 = vadd.f32 1.0, %v533_v10 }
  0x28   :  { %v82_v13 = vadd.f32 1.0, %v535_v11 }
  0x29   :  { %536 = vrcp.f32 %v81_v12 }
  0x2a   :  { %538 = vrcp.f32 %v82_v13 }
  0x2b   :  { %540 = vlog2.f32 %v81_v12 }
  0x2c   :  { %542 = vlog2.f32 %v82_v13 }
  0x33   :  { %v537_v20 = vpop.eup %536 }
  0x34   :  { %v539_v21 = vpop.eup %538  ;;  %v85_v22 = vmul.f32 %v537_v20, %v533_v10 }
  0x35   :  { %v541_v24 = vpop.eup %540  ;;  %v86_v25 = vmul.f32 %v539_v21, %v535_v11 }
  0x36   :  { %v543_v27 = vpop.eup %542  ;;  %v94_v28 = vmul.f32 0.6931472, %v541_v24  ;;  %v97_v29 = vmul.f32 %v85_v22, %v73_v4  ;;  %v688_v30 = vsel %vm87_vm2, %v537_v20, %v85_v22 }
  0x37   :  { %v690_v32 = vsel %vm88_vm3, %v539_v21, %v86_v25  ;;  %v96_v33 = vmul.f32 0.6931472, %v543_v27  ;;  %v98_v34 = vmul.f32 %v86_v25, %v74_v5  ;;  %v693_v35 = vsub.f32 1.0, %v688_v30 }
  0x38   :  { %v99_v36 = vadd.f32 %v97_v29, %v94_v28  ;;  %v696_v37 = vsub.f32 1.0, %v690_v32  ;;  %v109_v41 = vrot.slane %v688_v30, 7  ;;  %v110_v42 = vrot.slane %v690_v32, 7 }
  0x39   :  { %v100_v40 = vadd.f32 %v98_v34, %v96_v33  ;;  %v118_v43 = vrot.slane %v693_v35, 1  ;;  %v124_v46 = vrot.slane %v693_v35, 2  ;;  %v128_v47 = vrot.slane %v688_v30, 1 }
  0x3a   :  { %v119_v45 = vrot.slane %v696_v37, 1  ;;  %v125_v50 = vrot.slane %v696_v37, 2  ;;  %v129_v51 = vrot.slane %v690_v32, 1  ;;  %v134_v53 = vrot.slane %v693_v35, 3 }
  0x3b   :  { %v444_v48 = vadd.f32 %v100_v40, %v99_v36  ;;  %v122_v49 = vsel %vm113_vm4, %v118_v43, %v688_v30  ;;  %v135_v54 = vrot.slane %v696_v37, 3  ;;  %v138_v55 = vrot.slane %v688_v30, 2 }
  0x3c   :  { %v123_v52 = vsel %vm113_vm4, %v119_v45, %v690_v32  ;;  %v114_v56 = vsel %vm113_vm4, %v693_v35, %v109_v41  ;;  %v115_v57 = vsel %vm113_vm4, %v696_v37, %v110_v42  ;;  %v139_v58 = vrot.slane %v690_v32, 2 }
  0x3d   :  { %445 = vadd.xlane.f32.xlu0 %v444_v48  ;;  %v147_v59 = vrot.slane %v122_v49, %v699_v38  ;;  %v142_v60 = vsel %vm113_vm4, %v134_v53, %v138_v55  ;;  %v151_v61 = vrot.slane %v123_v52, %v699_v38  ;;  %v157_v62 = vrot.slane %v122_v49, %v702_v39 }
  0x3e   :  { %v161_v63 = vrot.slane %v123_v52, %v702_v39  ;;  %v132_v0 = vsel %vm113_vm4, %v124_v46, %v128_v47  ;;  %v133_v1 = vsel %vm113_vm4, %v125_v50, %v129_v51  ;;  %v143_v2 = vsel %vm113_vm4, %v135_v54, %v139_v58 }
  0x3f   :  { %v176_v3 = vrot.slane %v142_v60, %v699_v38  ;;  %v162_v4 = vmul.f32 %v157_v62, %v114_v56  ;;  %v180_v6 = vrot.slane %v143_v2, %v699_v38  ;;  %v186_v7 = vrot.slane %v142_v60, %v702_v39 }
  0x40   :  { %v163_v5 = vmul.f32 %v161_v63, %v115_v57  ;;  %v152_v8 = vmul.f32 %v147_v59, %v114_v56  ;;  %v190_v9 = vrot.slane %v143_v2, %v702_v39  ;;  %v258_v10 = vrot.slane %v693_v35, 4 }
  0x41   :  { %460 = vadd.xlane.f32.xlu0 %v459_v44  ;;  %v153_v11 = vmul.f32 %v151_v61, %v115_v57  ;;  %v181_v12 = vmul.f32 %v176_v3, %v132_v0  ;;  %v191_v13 = vmul.f32 %v186_v7, %v132_v0  ;;  %v259_v14 = vrot.slane %v696_v37, 4 }
  0x42   :  { %v166_v17 = vrot.slane %v162_v4, 6  ;;  %v182_v18 = vmul.f32 %v180_v6, %v133_v1  ;;  %v192_v19 = vmul.f32 %v190_v9, %v133_v1  ;;  %v262_v20 = vrot.slane %v688_v30, 3 }
  0x43   :  { %v167_v21 = vrot.slane %v163_v5, 6  ;;  %v195_v22 = vrot.slane %v191_v13, 6  ;;  %v263_v24 = vrot.slane %v690_v32, 3  ;;  %v268_v25 = vrot.slane %v693_v35, 5 }
  0x44   :  { %v196_v26 = vrot.slane %v192_v19, 6  ;;  %v269_v27 = vrot.slane %v696_v37, 5  ;;  %v272_v28 = vrot.slane %v688_v30, 4  ;;  %v273_v29 = vrot.slane %v690_v32, 4 }
  0x45   :  { %v745_v31 = vsel %vm170_vm5, %v181_v12, %v195_v22  ;;  %v748_v33 = vsub.s32 2, %v686_v23  ;;  %v751_v34 = vsel %vm170_vm5, %v152_v8, %v166_v17  ;;  %v266_v40 = vsel %vm113_vm4, %v258_v10, %v262_v20 }
  0x46   :  { %v754_v36 = vsel %vm170_vm5, %v182_v18, %v196_v26  ;;  %v758_v41 = vsub.s32 3, %v686_v23  ;;  %v761_v42 = vsel %vm170_vm5, %v153_v11, %v167_v21  ;;  %v267_v43 = vsel %vm113_vm4, %v259_v14, %v263_v24 }
  0x47   :  { %v278_v44 = vrot.slane %v693_v35, 6  ;;  %v282_v45 = vrot.slane %v688_v30, 5  ;;  %v214_v46 = vrot.slane %v745_v31, %v702_v39  ;;  %v276_v47 = vsel %vm113_vm4, %v268_v25, %v272_v28 }
  0x48   :  { %v277_v48 = vsel %vm113_vm4, %v269_v27, %v273_v29  ;;  %v288_v49 = vrot.slane %v693_v35, 7  ;;  %v218_v23 = vrot.slane %v754_v36, %v702_v39  ;;  %v279_v50 = vrot.slane %v696_v37, 6 }
  0x49   :  { %v283_v51 = vrot.slane %v690_v32, 5  ;;  %v289_v52 = vrot.slane %v696_v37, 7  ;;  %v204_v53 = vrot.slane %v745_v31, %v699_v38  ;;  %v208_v54 = vrot.slane %v754_v36, %v699_v38 }
  0x4a   :  { %v292_v55 = vrot.slane %v688_v30, 6  ;;  %v293_v56 = vrot.slane %v690_v32, 6  ;;  %v301_v35 = vrot.slane %v276_v47, %v699_v38  ;;  %v305_v57 = vrot.slane %v277_v48, %v699_v38 }
  0x4b   :  { %v311_v58 = vrot.slane %v276_v47, %v702_v39  ;;  %v315_v59 = vrot.slane %v277_v48, %v702_v39  ;;  %v219_v37 = vmul.f32 %v214_v46, %v751_v34  ;;  %v286_v60 = vsel %vm113_vm4, %v278_v44, %v282_v45 }
  0x4c   :  { %v296_v61 = vsel %vm113_vm4, %v288_v49, %v292_v55  ;;  %v297_v62 = vsel %vm113_vm4, %v289_v52, %v293_v56  ;;  %v220_v30 = vmul.f32 %v218_v23, %v761_v42  ;;  %v287_v32 = vsel %vm113_vm4, %v279_v50, %v283_v51 }
  0x4d   :  { %v316_v63 = vmul.f32 %v311_v58, %v266_v40  ;;  %v317_v0 = vmul.f32 %v315_v59, %v267_v43  ;;  %v329_v1 = vrot.slane %v296_v61, %v699_v38  ;;  %v333_v2 = vrot.slane %v297_v62, %v699_v38 }
  0x4e   :  { %v339_v3 = vrot.slane %v296_v61, %v702_v39  ;;  %v343_v4 = vrot.slane %v297_v62, %v702_v39  ;;  %v306_v5 = vmul.f32 %v301_v35, %v266_v40  ;;  %v307_v6 = vmul.f32 %v305_v57, %v267_v43 }
  0x4f   :  { %v320_v7 = vrot.slane %v316_v63, 6  ;;  %v321_v8 = vrot.slane %v317_v0, 6  ;;  %v334_v9 = vmul.f32 %v329_v1, %v286_v60  ;;  %v335_v10 = vmul.f32 %v333_v2, %v287_v32 }
  0x50   :  { %v344_v11 = vmul.f32 %v339_v3, %v286_v60  ;;  %v345_v12 = vmul.f32 %v343_v4, %v287_v32  ;;  %v209_v13 = vmul.f32 %v204_v53, %v751_v34  ;;  %v210_v14 = vmul.f32 %v208_v54, %v761_v42 }
  0x51   :  { %v243_v17 = vrot.slane %v219_v37, 4  ;;  %v244_v18 = vrot.slane %v220_v30, 4  ;;  %v234_v21 = vrot.slane %v745_v31, %v758_v41  ;;  %v238_v22 = vrot.slane %v754_v36, %v758_v41 }
  0x52   :  { %v348_v19 = vrot.slane %v344_v11, 6  ;;  %v349_v20 = vrot.slane %v345_v12, 6  ;;  %v324_v24 = vsel %vm170_vm5, %v306_v5, %v320_v7  ;;  %v325_v25 = vsel %vm170_vm5, %v307_v6, %v321_v8 }
  0x53   :  { %v224_v26 = vrot.slane %v745_v31, %v748_v33  ;;  %v228_v27 = vrot.slane %v754_v36, %v748_v33  ;;  %v239_v40 = vmul.f32 %v234_v21, %v751_v34  ;;  %v240_v43 = vmul.f32 %v238_v22, %v761_v42 }
  0x54   :  { %v352_v28 = vsel %vm170_vm5, %v334_v9, %v348_v19  ;;  %v353_v29 = vsel %vm170_vm5, %v335_v10, %v349_v20  ;;  %v254_v31 = vsel %vm253_vm6, %v209_v13, %v243_v17  ;;  %v255_v36 = vsel %vm253_vm6, %v210_v14, %v244_v18 }
  0x55   :  { %v357_v44 = vrot.slane %v352_v28, %v699_v38  ;;  %v361_v45 = vrot.slane %v353_v29, %v699_v38  ;;  %v367_v46 = vrot.slane %v352_v28, %v702_v39  ;;  %v371_v47 = vrot.slane %v353_v29, %v702_v39 }
  0x56   :  { %v377_v48 = vrot.slane %v352_v28, %v748_v33  ;;  %v381_v49 = vrot.slane %v353_v29, %v748_v33  ;;  %v229_v53 = vmul.f32 %v224_v26, %v751_v34  ;;  %v230_v38 = vmul.f32 %v228_v27, %v761_v42 }
  0x57   :  { %v362_v23 = vmul.f32 %v357_v44, %v324_v24  ;;  %v363_v50 = vmul.f32 %v361_v45, %v325_v25  ;;  %v372_v51 = vmul.f32 %v367_v46, %v324_v24  ;;  %v373_v52 = vmul.f32 %v371_v47, %v325_v25 }
  0x58   :  { %v249_v54 = vrot.slane %v239_v40, 4  ;;  %v250_v55 = vrot.slane %v240_v43, 4  ;;  %v387_v35 = vrot.slane %v352_v28, %v758_v41  ;;  %v391_v57 = vrot.slane %v353_v29, %v758_v41 }
  0x59   :  { %v396_v56 = vrot.slane %v372_v51, 4  ;;  %v397_v39 = vrot.slane %v373_v52, 4  ;;  %v382_v58 = vmul.f32 %v377_v48, %v324_v24  ;;  %v383_v59 = vmul.f32 %v381_v49, %v325_v25 }
  0x5a   :  { %v392_v60 = vmul.f32 %v387_v35, %v324_v24  ;;  %v393_v61 = vmul.f32 %v391_v57, %v325_v25  ;;  %v256_v42 = vsel %vm253_vm6, %v229_v53, %v249_v54  ;;  %v257_v30 = vsel %vm253_vm6, %v230_v38, %v250_v55 }
  0x5b   :  { %v406_v33 = vsel %vm253_vm6, %v362_v23, %v396_v56  ;;  %v407_v37 = vsel %vm253_vm6, %v363_v50, %v397_v39  ;;  %v522_v5 = vpack.c.bf16 %v682_v16, %v680_v15 }
  0x5c   :  { %v410_v62 = vadd.f32 %v406_v33, %v254_v31  ;;  %v411_v34 = vadd.f32 %v407_v37, %v255_v36  ;;  %v402_v32 = vrot.slane %v392_v60, 4  ;;  %v403_v63 = vrot.slane %v393_v61, 4 }
  0x5d   :  { %60 = vst [vmem:[#allocation8] sm:$0xff] %v522_v5 }
  0x5e   :  { %v433_v0 = vadd.f32 %v411_v34, %v410_v62  ;;  %v408_v1 = vsel %vm253_vm6, %v382_v58, %v402_v32  ;;  %v409_v41 = vsel %vm253_vm6, %v383_v59, %v403_v63 }
  0x5f   :  { %v412_v2 = vadd.f32 %v408_v1, %v256_v42  ;;  %v413_v3 = vadd.f32 %v409_v41, %v257_v30 }
  0x60   :  { %434 = vadd.xlane.f32.xlu1 %v433_v0 }
  0x61   :  { %v436_v4 = vadd.f32 %v413_v3, %v412_v2 }
  0x64   :  { %437 = vadd.xlane.f32.xlu1 %v436_v4 }
  0x65   :  { %577 = shalt.err (!%p574_p12)
}
  0x66   :  { %s578_s5 = scalar_lea.hbm %s877_s1, 128 }
  0x67   :  { %p579_p13 = scmp.ne.s32.totalorder %s877_s1, %s578_s5  ;;  %p582_p0 = scmp.lt.u32.totalorder %s578_s5, %s877_s1 }
  0x69   :  { %p584_p1 = pnand %p582_p0, %p579_p13 }
  0x6b   :  { %587 = shalt.err (!%p584_p1)
}
  0x6c   :  { %484 = dma.vmem_to_hbm [thread:$0]  %s482_s27, 128, %s877_s1, [#allocation7]   ;;  %vm439_vm7 = vcmask 7168   ;;  %vm455_vm8 = vcmask 0  }
  0x6d   :  { %s641_s15 = smov [#allocation9]   ;;  %s642_s18 = smov [#allocation11]  }
  0x6e   :  { %s493_s16 = sshll.u32 %s641_s15, 4  ;;  %s503_s19 = sshll.u32 %s642_s18, 4  ;;  %s494_s16 = int_to_ptr.vmem [resolvable:$true] %s493_s16  ;;  %s504_s19 = int_to_ptr.vmem [resolvable:$true] %s503_s19 }
  0x6f   :  { %s588_s20 = scalar_lea.vmem %s494_s16, 16  ;;  %s592_s21 = scalar_lea.vmem %s494_s16, 32 }
  0x70   :  { %p589_p2 = scmp.ne.s32.totalorder %s494_s16, %s588_s20  ;;  %p593_p3 = scmp.lt.s32.totalorder %s494_s16, %s494_s16 }
  0x71   :  { %p594_p4 = scmp.lt.s32.totalorder %s592_s21, %s588_s20 }
  0x73   :  { %p595_p5 = por %p594_p4, %p593_p3 }
  0x75   :  { %p596_p6 = pnand %p595_p5, %p589_p2 }
  0xca   :  { %v446_v15 = vpop.xlane.xlu0 %445 }
  0xcb   :  { %v447_v16 = vrot.slane %v446_v15, 4 }
  0xcd   :  { %v448_v6 = vadd.f32 %v447_v16, %v446_v15 }
  0xce   :  { %v461_v7 = vpop.xlane.xlu0 %460 }
  0xcf   :  { %v449_v8 = vrot.slane %v448_v6, 2  ;;  %v462_v9 = vrot.slane %v461_v7, 4 }
  0xd1   :  { %v463_v10 = vadd.f32 %v462_v9, %v461_v7  ;;  %v450_v11 = vadd.f32 %v449_v8, %v448_v6 }
  0xd3   :  { %v464_v12 = vrot.slane %v463_v10, 2  ;;  %v451_v13 = vrot.slane %v450_v11, 1 }
  0xd5   :  { %v465_v14 = vadd.f32 %v464_v12, %v463_v10  ;;  %v452_v17 = vadd.f32 %v451_v13, %v450_v11 }
  0xd7   :  { %523 = vpush %v452_v17  ;;  %v466_v18 = vrot.slane %v465_v14, 1 }
  0xd9   :  { %v467_v19 = vadd.f32 %v466_v18, %v465_v14 }
  0xdb   :  { %525 = vpush %v467_v19 }
  0xed   :  { %v435_v20 = vpop.xlane.xlu1 %434 }
  0xee   :  { %440 = vst.msk [vmem:[%s878_s2] sm:$0xff] %vm439_vm7, %v435_v20 }
  0xf1   :  { %v438_v21 = vpop.xlane.xlu1 %437 }
  0xf2   :  { %441 = vst.msk [vmem:[%s878_s2 + $0x8] sm:$0xff] %vm439_vm7, %v438_v21 }
 0x108   :  { %s524_s17 = spop %523 }
 0x109   :  { %v454_v22 = vstv %s524_s17 }
 0x10a   :  { %456 = vst.msk [vmem:[#allocation9] sm:$0x1] %vm455_vm8, %v454_v22 }
 0x10b   :  { %599 = shalt.err (!%p596_p6)
}
 0x10c   :  { %s600_s23 = scalar_lea.hbm %s879_s3, 16 }
 0x10d   :  { %p601_p7 = scmp.ne.s32.totalorder %s879_s3, %s600_s23  ;;  %p604_p8 = scmp.lt.u32.totalorder %s600_s23, %s879_s3 }
 0x10f   :  { %p606_p9 = pnand %p604_p8, %p601_p7 }
 0x111   :  { %609 = shalt.err (!%p606_p9)
}
 0x112   :  { %496 = dma.vmem_to_hbm [thread:$0]  %s494_s16, 16, %s879_s3, [#allocation10]  }
 0x113   :  { %s526_s29 = spop %525  ;;  %s610_s30 = scalar_lea.vmem %s504_s19, 16 }
 0x114   :  { %v469_v24 = vstv %s526_s29  ;;  %p611_p10 = scmp.ne.s32.totalorder %s504_s19, %s610_s30  ;;  %s614_s5 = scalar_lea.vmem %s504_s19, 32 }
 0x115   :  { %470 = vst.msk [vmem:[#allocation11] sm:$0x1] %vm455_vm8, %v469_v24  ;;  %p615_p11 = scmp.lt.s32.totalorder %s504_s19, %s504_s19  ;;  %p616_p12 = scmp.lt.s32.totalorder %s614_s5, %s610_s30 }
 0x117   :  { %p617_p13 = por %p616_p12, %p615_p11 }
 0x119   :  { %p618_p0 = pnand %p617_p13, %p611_p10 }
 0x11b   :  { %621 = shalt.err (!%p618_p0)
}
 0x11c   :  { %s622_s8 = scalar_lea.hbm %s880_s4, 16 }
 0x11d   :  { %p623_p1 = scmp.ne.s32.totalorder %s880_s4, %s622_s8  ;;  %p626_p2 = scmp.lt.u32.totalorder %s622_s8, %s880_s4 }
 0x11f   :  { %p628_p3 = pnand %p626_p2, %p623_p1 }
 0x121   :  { %631 = shalt.err (!%p628_p3)
}
 0x122   :  { %506 = dma.vmem_to_hbm [thread:$0]  %s504_s19, 16, %s880_s4, [#allocation10]  }
 0x123   :  { %634 = dma.done.wait [#allocation7], 128  }
 0x124   :  { %635 = vsyncadd [#allocation7], 4294967168 }
 0x125   :  { %636 = dma.done.wait [#allocation10], 32  }
 0x126   :  { %637 = vsyncadd [#allocation10], 4294967264 }
 0x127   :  { %518 = vsyncpa [#allocation6], 1 }
 0x128   :  { %519 = vsyncpa [#allocation7], 1 }
 0x129   :  { %520 = vsyncpa [#allocation10], 1 }

</bundles_post_ra>
